<compile_context>
chip_gen: v7x
topology: tpu7x:2x2x1
jax: 0.10.0
libtpu: 0.0.40
codegen_flags: <defaults>
</compile_context>

<pallas_src>
import functools
import math

import jax
import jax.numpy as jnp
from jax.experimental import pallas as pl
from jax.experimental.pallas import tpu as pltpu

LANE = 128
SUBLANE = 8
NEG_INF = -1e30  # padded-class bias; exp() underflows to 0 in the logsumexp


def _round_up(x, m):
    return ((x + m - 1) // m) * m


def _mini_cnn_kernel(x_ref, w1_ref, w3_ref, bias_ref, out_ref, *, hpad, cpad):
    # fc1 with BatchNorm folded into the weights/bias. bf16 MXU, f32 accumulate.
    h = jnp.dot(x_ref[...], w1_ref[...], preferred_element_type=jnp.float32)
    h = h + bias_ref[0:1, :hpad]          # fused (b1 - mean) * scale + beta
    h = jnp.maximum(h, 0.0)               # relu1  (dropout1 = identity in eval)

    # fc3
    logits = jnp.dot(h.astype(jnp.bfloat16), w3_ref[...],
                     preferred_element_type=jnp.float32)
    logits = logits + bias_ref[1:2, :cpad]   # padded classes get -1e30 bias

    # log_softmax over classes (lane-dense padded width; pads contribute 0)
    m = jnp.max(logits, axis=-1, keepdims=True)
    shifted = logits - m
    lse = jnp.log(jnp.sum(jnp.exp(shifted), axis=-1, keepdims=True))
    out_ref[...] = (shifted - lse).astype(out_ref.dtype)


def fuse_and_pad_params(params, eps=1e-5):
    """One-time parameter prep: fold eval-mode BN into fc1, pad to lane width, cast."""
    w1 = params["w1"]
    b1 = params["b1"].reshape(-1)
    gamma = params["bn_gamma"].reshape(-1)
    beta = params["bn_beta"].reshape(-1)
    mean = params["bn_mean"].reshape(-1)
    var = params["bn_var"].reshape(-1)
    w3 = params["w3"]
    b3 = params["b3"].reshape(-1)

    F, H = w1.shape
    C = w3.shape[1]
    Fpad = _round_up(F, LANE)
    Hpad = _round_up(H, LANE)
    Cpad = _round_up(C, LANE)

    # BN fold:  bn(fc1(x)) == x @ (w1 * scale) + ((b1 - mean) * scale + beta)
    scale = gamma * jax.lax.rsqrt(var + eps)
    w1_fused = w1 * scale[None, :]
    b1_fused = (b1 - mean) * scale + beta

    w1p = jnp.zeros((Fpad, Hpad), jnp.bfloat16).at[:F, :H].set(
        w1_fused.astype(jnp.bfloat16))
    w3p = jnp.zeros((Hpad, Cpad), jnp.bfloat16).at[:H, :C].set(
        w3.astype(jnp.bfloat16))

    # Pack both bias rows into one small f32 block (row 0: b1', row 1: b3 padded
    # with -1e30 so padded class columns never perturb max / logsumexp).
    lmax = max(Hpad, Cpad)
    bias = jnp.zeros((2, lmax), jnp.float32)
    bias = bias.at[0, :H].set(b1_fused)
    bias = bias.at[1, :].set(NEG_INF)
    bias = bias.at[1, :C].set(b3)

    return {"w1": w1p, "w3": w3p, "bias": bias,
            "dims": (F, H, C, Fpad, Hpad, Cpad)}


def mini_cnn_each_net_forward(x, fused, filters, *, batch_tile=256):
    """x: [B, F] float32.  Returns (log_probs [B, C] float32, filters)."""
    F, H, C, Fpad, Hpad, Cpad = fused["dims"]
    B = x.shape[0]

    TB = batch_tile if B >= batch_tile else _round_up(max(B, SUBLANE), SUBLANE)
    Bpad = _round_up(B, TB)
    num_blocks = Bpad // TB

    # Pad batch/features to tile sizes and cast activations to bf16 for the MXU.
    xp = jnp.zeros((Bpad, Fpad), jnp.bfloat16).at[:B, :F].set(
        x.astype(jnp.bfloat16))

    lmax = fused["bias"].shape[1]
    # VMEM budget: double-buffered x/out tiles + resident weights/bias, 2x headroom.
    vmem_bytes = (2 * (2 * TB * Fpad * 2 + 2 * TB * Cpad * 4)
                  + 2 * (Fpad * Hpad * 2 + Hpad * Cpad * 2 + 2 * lmax * 4)
                  + (1 << 20))
    vmem_bytes = int(min(max(vmem_bytes, 4 << 20), 48 << 20))

    kernel = functools.partial(_mini_cnn_kernel, hpad=Hpad, cpad=Cpad)

    log_probs_padded = pl.pallas_call(
        kernel,
        out_shape=jax.ShapeDtypeStruct((Bpad, Cpad), jnp.float32),
        grid=(num_blocks,),
        in_specs=[
            pl.BlockSpec((TB, Fpad), lambda i: (i, 0)),      # x tile (pipelined)
            pl.BlockSpec((Fpad, Hpad), lambda i: (0, 0)),    # fused w1 (resident)
            pl.BlockSpec((Hpad, Cpad), lambda i: (0, 0)),    # w3 (resident)
            pl.BlockSpec((2, lmax), lambda i: (0, 0)),       # packed biases (resident)
        ],
        out_specs=pl.BlockSpec((TB, Cpad), lambda i: (i, 0)),
        compiler_params=pltpu.CompilerParams(
            dimension_semantics=("parallel",),
            vmem_limit_bytes=vmem_bytes),
    )(xp, fused["w1"], fused["w3"], fused["bias"])

    return log_probs_padded[:B, :C], filters


def init_params(key, fc_len, mini_fc_len, num_class):
    """Deterministic init mimicking PyTorch nn.Linear default (U(-1/sqrt(fan_in), ..))."""
    k1, k2, k3, k4 = jax.random.split(key, 4)
    bound1 = 1.0 / math.sqrt(fc_len)
    bound3 = 1.0 / math.sqrt(mini_fc_len)
    return {
        # fc1: Linear(fc_len, mini_fc_len); stored as [in, out]
        "w1": jax.random.uniform(k1, (fc_len, mini_fc_len), jnp.float32, -bound1, bound1),
        "b1": jax.random.uniform(k2, (1, mini_fc_len), jnp.float32, -bound1, bound1),
        # bn1: BatchNorm1d(mini_fc_len), default init
        "bn_gamma": jnp.ones((1, mini_fc_len), jnp.float32),
        "bn_beta": jnp.zeros((1, mini_fc_len), jnp.float32),
        "bn_mean": jnp.zeros((1, mini_fc_len), jnp.float32),
        "bn_var": jnp.ones((1, mini_fc_len), jnp.float32),
        # fc3: Linear(mini_fc_len, num_class); stored as [in, out]
        "w3": jax.random.uniform(k3, (mini_fc_len, num_class), jnp.float32, -bound3, bound3),
        "b3": jax.random.uniform(k4, (1, num_class), jnp.float32, -bound3, bound3),
    }
    # NOTE: fc2/bn2/relu2/dropout2/convert_identity exist in __init__ but are
    # never used in forward(), so they are intentionally not materialized.


def _reference_forward(x, params, eps=1e-5):
    h = x @ params["w1"] + params["b1"]
    h = (h - params["bn_mean"]) * jax.lax.rsqrt(params["bn_var"] + eps) \
        * params["bn_gamma"] + params["bn_beta"]
    h = jnp.maximum(h, 0.0)
    logits = h @ params["w3"] + params["b3"]
    return jax.nn.log_softmax(logits, axis=1)


if __name__ == "__main__":
    # Small shapes consistent with the module's forward:
    #   fc_len = emb_dim = 32, mini_fc_len = 32, num_class = 8, batch = 8
    B, FC_LEN, MINI_FC_LEN, NUM_CLASS = 8, 32, 32, 8

    key = jax.random.PRNGKey(0)
    kx, kp = jax.random.split(key)
    x = jax.random.normal(kx, (B, FC_LEN), jnp.float32)
    params = init_params(kp, FC_LEN, MINI_FC_LEN, NUM_CLASS)
    fused = fuse_and_pad_params(params)
    filters = {"dummy_filter": jnp.arange(4, dtype=jnp.float32)}

    log_probs, filters_out = mini_cnn_each_net_forward(x, fused, filters)
    log_probs = jax.block_until_ready(log_probs)

    # sanity: shape, rows of exp(log_probs) sum to 1, matches f32 reference (bf16 tol)
    assert log_probs.shape == (B, NUM_CLASS)
    row_sums = jnp.sum(jnp.exp(log_probs), axis=1)
    assert bool(jnp.all(jnp.abs(row_sums - 1.0) < 1e-4))
    ref = _reference_forward(x, params)
    assert bool(jnp.max(jnp.abs(log_probs - ref)) < 1e-1)

    print("KERNEL_OK")
</pallas_src>

<mosaic_0001>
module attributes {stable_mosaic.version = 11 : i64} {
  func.func @_mini_cnn_kernel(%arg0: i32, %arg1: memref<8x128xbf16, #tpu.memory_space<vmem>>, %arg2: memref<128x128xbf16, #tpu.memory_space<vmem>>, %arg3: memref<128x128xbf16, #tpu.memory_space<vmem>>, %arg4: memref<2x128xf32, #tpu.memory_space<vmem>>, %arg5: memref<8x128xf32, #tpu.memory_space<vmem>>) attributes {dimension_semantics = [#tpu.dimension_semantics<parallel>], iteration_bounds = array<i64: 1>, scalar_prefetch = 0 : i64, scratch_operands = 0 : i64, tpu.core_type = #tpu.core_type<tc>, window_params = [{transform_indices = @transform_0, window_bounds = array<i64: 8, 128>}, {pipeline_mode = #tpu.pipeline_mode<synchronous>, transform_indices = @transform_1, window_bounds = array<i64: 128, 128>}, {pipeline_mode = #tpu.pipeline_mode<synchronous>, transform_indices = @transform_2, window_bounds = array<i64: 128, 128>}, {pipeline_mode = #tpu.pipeline_mode<synchronous>, transform_indices = @transform_3, window_bounds = array<i64: 2, 128>}, {transform_indices = @transform_4, window_bounds = array<i64: 8, 128>}]} {
    %c0 = arith.constant 0 : index
    %c0_0 = arith.constant 0 : index
    %0 = vector.load %arg1[%c0, %c0_0] : memref<8x128xbf16, #tpu.memory_space<vmem>>, vector<8x128xbf16>
    %c0_1 = arith.constant 0 : index
    %c0_2 = arith.constant 0 : index
    %1 = vector.load %arg2[%c0_1, %c0_2] : memref<128x128xbf16, #tpu.memory_space<vmem>>, vector<128x128xbf16>
    %cst = arith.constant dense<0.000000e+00> : vector<8x128xf32>
    %2 = tpu.matmul %0, %1, %cst {dimension_numbers = #tpu.dot_dimension_numbers<[1], [0], [0], [1], [0, 0, 1, 1], [], []>} : vector<8x128xbf16>, vector<128x128xbf16>, vector<8x128xf32> -> vector<8x128xf32>
    %c0_3 = arith.constant 0 : index
    %c0_4 = arith.constant 0 : index
    %3 = vector.load %arg4[%c0_3, %c0_4] : memref<2x128xf32, #tpu.memory_space<vmem>>, vector<1x128xf32>
    %4 = vector.broadcast %3 : vector<1x128xf32> to vector<8x128xf32>
    %5 = arith.addf %2, %4 : vector<8x128xf32>
    %cst_5 = arith.constant 0.000000e+00 : f32
    %6 = vector.broadcast %cst_5 : f32 to vector<8x128xf32>
    %7 = arith.maximumf %5, %6 : vector<8x128xf32>
    %8 = arith.truncf %7 : vector<8x128xf32> to vector<8x128xbf16>
    %c0_6 = arith.constant 0 : index
    %c0_7 = arith.constant 0 : index
    %9 = vector.load %arg3[%c0_6, %c0_7] : memref<128x128xbf16, #tpu.memory_space<vmem>>, vector<128x128xbf16>
    %cst_8 = arith.constant dense<0.000000e+00> : vector<8x128xf32>
    %10 = tpu.matmul %8, %9, %cst_8 {dimension_numbers = #tpu.dot_dimension_numbers<[1], [0], [0], [1], [0, 0, 1, 1], [], []>} : vector<8x128xbf16>, vector<128x128xbf16>, vector<8x128xf32> -> vector<8x128xf32>
    %c1 = arith.constant 1 : index
    %c0_9 = arith.constant 0 : index
    %11 = vector.load %arg4[%c1, %c0_9] : memref<2x128xf32, #tpu.memory_space<vmem>>, vector<1x128xf32>
    %12 = vector.broadcast %11 : vector<1x128xf32> to vector<8x128xf32>
    %13 = arith.addf %10, %12 : vector<8x128xf32>
    %cst_10 = arith.constant dense<0xFF800000> : vector<8xf32>
    %14 = vector.multi_reduction <maximumf>, %13, %cst_10 [1] : vector<8x128xf32> to vector<8xf32>
    %15 = vector.shape_cast %14 : vector<8xf32> to vector<8x1xf32>
    %16 = vector.broadcast %15 : vector<8x1xf32> to vector<8x128xf32>
    %17 = arith.subf %13, %16 : vector<8x128xf32>
    %18 = math.exp %17 : vector<8x128xf32>
    %cst_11 = arith.constant dense<0.000000e+00> : vector<8xf32>
    %19 = vector.multi_reduction <add>, %18, %cst_11 [1] : vector<8x128xf32> to vector<8xf32>
    %20 = vector.shape_cast %19 : vector<8xf32> to vector<8x1xf32>
    %21 = math.log %20 : vector<8x1xf32>
    %22 = vector.broadcast %21 : vector<8x1xf32> to vector<8x128xf32>
    %23 = arith.subf %17, %22 : vector<8x128xf32>
    %c0_12 = arith.constant 0 : index
    %c0_13 = arith.constant 0 : index
    %24 = vector.load %arg5[%c0_12, %c0_13] : memref<8x128xf32, #tpu.memory_space<vmem>>, vector<8x128xf32>
    tpu.vector_store %arg5[%c0_12, %c0_13], %23 {strides = array<i32>} : memref<8x128xf32, #tpu.memory_space<vmem>>, vector<8x128xf32>,
    return
  }
  func.func @transform_0(%arg0: i32) -> (i32, i32) {
    %c0_i32 = arith.constant 0 : i32
    %c0_i32_0 = arith.constant 0 : i32
    return %arg0, %c0_i32 : i32, i32
  }
  func.func @transform_1(%arg0: i32) -> (i32, i32) {
    %c0_i32 = arith.constant 0 : i32
    %c0_i32_0 = arith.constant 0 : i32
    %c0_i32_1 = arith.constant 0 : i32
    return %c0_i32, %c0_i32_0 : i32, i32
  }
  func.func @transform_2(%arg0: i32) -> (i32, i32) {
    %c0_i32 = arith.constant 0 : i32
    %c0_i32_0 = arith.constant 0 : i32
    %c0_i32_1 = arith.constant 0 : i32
    return %c0_i32, %c0_i32_0 : i32, i32
  }
  func.func @transform_3(%arg0: i32) -> (i32, i32) {
    %c0_i32 = arith.constant 0 : i32
    %c0_i32_0 = arith.constant 0 : i32
    %c0_i32_1 = arith.constant 0 : i32
    return %c0_i32, %c0_i32_0 : i32, i32
  }
  func.func @transform_4(%arg0: i32) -> (i32, i32) {
    %c0_i32 = arith.constant 0 : i32
    %c0_i32_0 = arith.constant 0 : i32
    return %arg0, %c0_i32 : i32, i32
  }
}

</mosaic_0001>

<bundles_post_ra>
// kernel: tpu_custom_call.1
= control target key start
LH: loop header
LB: loop body
LE: loop exit
PB: predicated region body
PF: predicated region fallthrough
CT: control target
= control target key end

     0   :  { %9 = vsyncpa [#allocation3], 0  ;;  %s597_s0 = inlined_call_operand.hbm [shape: bf16[8,128], index: 0, kind: input, shape index: {}]   ;;  %s598_s1 = inlined_call_operand.hbm [shape: bf16[128,128], index: 1, kind: input, shape index: {}]   ;;  %s599_s2 = inlined_call_operand.hbm [shape: bf16[128,128], index: 2, kind: input, shape index: {}]   ;;  %s600_s3 = inlined_call_operand.vmem [shape: f32[2,128], index: 3, kind: input, shape index: {}]   ;;  %s601_s4 = inlined_call_operand.hbm [shape: f32[8,128], index: 4, kind: output, shape index: {}]  }
   0x1   :  { %10 = vsyncpa [#allocation6], 0 }
   0x2   :  { %11 = vsyncpa [#allocation4], 0  ;;  %s504_s15 = smov [#allocation5]   ;;  %s410_s19 = scalar_lea.hbm %s598_s1, 1024 }
   0x3   :  { %s27_s16 = sshll.u32 %s504_s15, 4  ;;  %p411_p0 = scmp.ne.s32.totalorder %s598_s1, %s410_s19  ;;  %s28_s16 = int_to_ptr.vmem [resolvable:$true] %s27_s16 }
   0x4   :  { %p414_p1 = scmp.lt.u32.totalorder %s410_s19, %s598_s1 }
   0x6   :  { %p416_p2 = pnand %p414_p1, %p411_p0 }
   0x8   :  { %419 = shalt.err (!%p416_p2)
}
   0x9   :  { %s420_s24 = scalar_lea.vmem %s28_s16, 1024  ;;  %p425_p4 = scmp.lt.s32.totalorder %s28_s16, %s28_s16 }
   0xa   :  { %p421_p3 = scmp.ne.s32.totalorder %s28_s16, %s420_s24  ;;  %p426_p5 = scmp.lt.s32.totalorder %s420_s24, %s420_s24 }
   0xc   :  { %p427_p6 = por %p426_p5, %p425_p4 }
   0xe   :  { %p428_p7 = pnand %p427_p6, %p421_p3 }
  0x10   :  { %431 = shalt.err (!%p428_p7)
}
  0x11   :  { %s505_s25 = smov 64   ;;  %s506_s26 = smov 4  }
  0x12   :  { %33 = dma.hbm_to_vmem [thread:$0]  %s598_s1, 1024, %s28_s16, [#allocation6], %s505_s25, %s505_s25, %s506_s26  }
  0x13   :  { %s507_s29 = smov [#allocation2]   ;;  %s508_s5 = smov [#allocation7]  }
  0x14   :  { %s18_s30 = sshll.u32 %s507_s29, 4  ;;  %s39_s6 = sshll.u32 %s508_s5, 4  ;;  %s19_s30 = int_to_ptr.vmem [resolvable:$true] %s18_s30  ;;  %s40_s6 = int_to_ptr.vmem [resolvable:$true] %s39_s6 }
  0x15   :  { %s432_s9 = scalar_lea.hbm %s597_s0, 64 }
  0x16   :  { %p433_p8 = scmp.ne.s32.totalorder %s597_s0, %s432_s9  ;;  %p436_p9 = scmp.lt.u32.totalorder %s432_s9, %s597_s0 }
  0x18   :  { %p438_p10 = pnand %p436_p9, %p433_p8 }
  0x1a   :  { %441 = shalt.err (!%p438_p10)
}
  0x1b   :  { %s442_s1 = scalar_lea.vmem %s19_s30, 64  ;;  %p447_p12 = scmp.lt.s32.totalorder %s19_s30, %s19_s30 }
  0x1c   :  { %p443_p11 = scmp.ne.s32.totalorder %s19_s30, %s442_s1  ;;  %p448_p13 = scmp.lt.s32.totalorder %s442_s1, %s442_s1 }
  0x1e   :  { %p449_p0 = por %p448_p13, %p447_p12 }
  0x20   :  { %p450_p1 = pnand %p449_p0, %p443_p11 }
  0x22   :  { %453 = shalt.err (!%p450_p1)
}
  0x23   :  { %21 = dma.hbm_to_vmem [thread:$0]  %s597_s0, 64, %s19_s30, [#allocation3]  }
  0x24   :  { %s454_s18 = scalar_lea.hbm %s599_s2, 1024 }
  0x25   :  { %p455_p2 = scmp.ne.s32.totalorder %s599_s2, %s454_s18  ;;  %p458_p3 = scmp.lt.u32.totalorder %s454_s18, %s599_s2 }
  0x27   :  { %p460_p4 = pnand %p458_p3, %p455_p2 }
  0x29   :  { %463 = shalt.err (!%p460_p4)
}
  0x2a   :  { %s464_s23 = scalar_lea.vmem %s40_s6, 1024  ;;  %p469_p6 = scmp.lt.s32.totalorder %s40_s6, %s40_s6 }
  0x2b   :  { %p465_p5 = scmp.ne.s32.totalorder %s40_s6, %s464_s23  ;;  %p470_p7 = scmp.lt.s32.totalorder %s464_s23, %s464_s23 }
  0x2d   :  { %p471_p8 = por %p470_p7, %p469_p6 }
  0x2f   :  { %p472_p9 = pnand %p471_p8, %p465_p5 }
  0x31   :  { %475 = shalt.err (!%p472_p9)
}
  0x32   :  { %45 = dma.hbm_to_vmem [thread:$0]  %s599_s2, 1024, %s40_s6, [#allocation6], %s505_s25, %s505_s25, %s506_s26  }
  0x33   :  { %498 = dma.done.wait [#allocation3], 64  }
  0x34   :  { %499 = vsyncadd [#allocation3], 4294967232 }
  0x35   :  { %500 = dma.done.wait [#allocation6], 2048  }
  0x36   :  { %501 = vsyncadd [#allocation6], 4294965248  ;;  %v509_v0 = vmov 0.0   ;;  %vm510_vm0 = vmmov 0   ;;  %v390_v1 = vld [vmem:[#allocation5] sm:$0xff]   ;;  %v391_v2 = vld [vmem:[#allocation5 + $0x8] sm:$0xff]  }
  0x37   :  { %342 = vmatprep.subr.bf16.mxu0 %v509_v0  ;;  %358 = vmatprep.mubr.msk.bf16.mxu0 %vm510_vm0, %v509_v0  ;;  %v392_v3 = vld [vmem:[#allocation5 + $0x10] sm:$0xff]   ;;  %v398_v4 = vld [vmem:[#allocation7] sm:$0xff]   ;;  %v393_v5 = vld [vmem:[#allocation5 + $0x18] sm:$0xff]   ;;  %s511_s28 = smov [#allocation8]  }
  0x38   :  { %362 = vmatprep.subr.bf16.mxu1 %v509_v0  ;;  %378 = vmatprep.mubr.msk.bf16.mxu1 %vm510_vm0, %v509_v0  ;;  %v399_v6 = vld [vmem:[#allocation7 + $0x8] sm:$0xff]   ;;  %v394_v7 = vld [vmem:[#allocation5 + $0x20] sm:$0xff]   ;;  %v400_v8 = vld [vmem:[#allocation7 + $0x10] sm:$0xff]   ;;  %s296_s29 = sshll.u32 %s511_s28, 4  ;;  %s297_s29 = int_to_ptr.vmem [resolvable:$true] %s296_s29 }
  0x39   :  { %343 = vmatpush3.bf16.msra.mxu0 %v390_v1  ;;  %363 = vmatpush3.bf16.msra.mxu1 %v398_v4  ;;  %v395_v9 = vld [vmem:[#allocation5 + $0x28] sm:$0xff]   ;;  %v401_v10 = vld [vmem:[#allocation7 + $0x18] sm:$0xff]   ;;  %v396_v11 = vld [vmem:[#allocation5 + $0x30] sm:$0xff]   ;;  %p481_p11 = scmp.lt.s32.totalorder %s297_s29, %s297_s29 }
  0x3a   :  { %344 = vmatprep.subr.bf16.mxu0 %v509_v0  ;;  %364 = vmatprep.subr.bf16.mxu1 %v509_v0  ;;  %v402_v12 = vld [vmem:[#allocation7 + $0x20] sm:$0xff]   ;;  %v397_v13 = vld [vmem:[#allocation5 + $0x38] sm:$0xff]   ;;  %v403_v14 = vld [vmem:[#allocation7 + $0x28] sm:$0xff]  }
  0x3b   :  { %v58_v15 = vld [vmem:[#allocation2] sm:$0xf]  ;;  %v404_v16 = vld [vmem:[#allocation7 + $0x30] sm:$0xff]  }
  0x3c   :  { %v405_v17 = vld [vmem:[#allocation7 + $0x38] sm:$0xff]  }
  0x3d   :  { %345 = vmatpush3.bf16.msra.mxu0 %v391_v2  ;;  %365 = vmatpush3.bf16.msra.mxu1 %v399_v6  ;;  %v306_v18 = vld [vmem:[%s600_s3] ss:$0 sm:$0xff]  ;;  %v315_v26 = vld [vmem:[%s600_s3 + $0x1] ss:$0 sm:$0xff]  ;;  %s476_s3 = scalar_lea.vmem %s297_s29, 128 }
  0x3e   :  { %346 = vmatprep.subr.bf16.mxu0 %v509_v0  ;;  %366 = vmatprep.subr.bf16.mxu1 %v509_v0  ;;  %p477_p10 = scmp.ne.s32.totalorder %s297_s29, %s476_s3  ;;  %p482_p12 = scmp.lt.s32.totalorder %s476_s3, %s476_s3 }
  0x40   :  { %p483_p13 = por %p482_p12, %p481_p11 }
  0x41   :  { %347 = vmatpush3.bf16.msra.mxu0 %v392_v3  ;;  %367 = vmatpush3.bf16.msra.mxu1 %v400_v8 }
  0x42   :  { %348 = vmatprep.subr.bf16.mxu0 %v509_v0  ;;  %368 = vmatprep.subr.bf16.mxu1 %v509_v0  ;;  %p484_p0 = pnand %p483_p13, %p477_p10 }
  0x45   :  { %349 = vmatpush3.bf16.msra.mxu0 %v393_v5  ;;  %369 = vmatpush3.bf16.msra.mxu1 %v401_v10 }
  0x46   :  { %350 = vmatprep.subr.bf16.mxu0 %v509_v0  ;;  %370 = vmatprep.subr.bf16.mxu1 %v509_v0 }
  0x49   :  { %351 = vmatpush3.bf16.msra.mxu0 %v394_v7  ;;  %371 = vmatpush3.bf16.msra.mxu1 %v402_v12 }
  0x4a   :  { %352 = vmatprep.subr.bf16.mxu0 %v509_v0  ;;  %372 = vmatprep.subr.bf16.mxu1 %v509_v0 }
  0x4d   :  { %353 = vmatpush3.bf16.msra.mxu0 %v395_v9  ;;  %373 = vmatpush3.bf16.msra.mxu1 %v403_v14 }
  0x4e   :  { %354 = vmatprep.subr.bf16.mxu0 %v509_v0  ;;  %374 = vmatprep.subr.bf16.mxu1 %v509_v0 }
  0x51   :  { %355 = vmatpush3.bf16.msra.mxu0 %v396_v11  ;;  %375 = vmatpush3.bf16.msra.mxu1 %v404_v16 }
  0x52   :  { %356 = vmatprep.subr.bf16.mxu0 %v509_v0  ;;  %376 = vmatprep.subr.bf16.mxu1 %v509_v0 }
  0x55   :  { %357 = vmatpush3.bf16.msra.mxu0 %v397_v13  ;;  %377 = vmatpush3.bf16.msra.mxu1 %v405_v17 }
  0x58   :  { %359 = vmatmul.mubr.bf16.vlgmr.msra.gmra.mrb[0].mxu0 %v58_v15 }
 0x12b   :  { %v162_v19 = vpop.f32.mrb[0].mxu0 }
 0x12c   :  { %v163_v20 = vadd.f32 %v306_v18, %v162_v19  ;;  %v360_v21 = vpop.f32.mrb[1].mxu0 }
 0x12d   :  { %v165_v22 = vpop.f32.mrb[2].mxu0 }
 0x12e   :  { %v168_v23 = vmax.f32 %v163_v20, 0.0  ;;  %v361_v24 = vpop.f32.mrb[3].mxu0 }
 0x130   :  { %v169_v25 = vpack.c.bf16 %v168_v23, %v168_v23 }
 0x132   :  { %379 = vmatmul.mubr.bf16.vlgmr.msra.gmra.mrb[0].mxu1 %v169_v25 }
 0x205   :  { %v273_v27 = vpop.f32.mrb[0].mxu1 }
 0x206   :  { %v274_v28 = vadd.f32 %v315_v26, %v273_v27  ;;  %v380_v29 = vpop.f32.mrb[1].mxu1 }
 0x207   :  { %v276_v30 = vpop.f32.mrb[2].mxu1 }
 0x208   :  { %279 = vmax.xlane.f32.xlu0 %v274_v28  ;;  %v381_v31 = vpop.f32.mrb[3].mxu1 }
 0x295   :  { %v280_v32 = vpop.xlane.xlu0 %279 }
 0x296   :  { %v281_v33 = vsub.f32 %v274_v28, %v280_v32 }
 0x298   :  { %v282_v34 = vmul.f32 1.442695, %v281_v33 }
 0x29a   :  { %406 = vpow2.f32 %v282_v34 }
 0x2a4   :  { %v407_v35 = vpop.eup %406 }
 0x2a5   :  { %284 = vadd.xlane.f32.xlu0 %v407_v35 }
 0x332   :  { %v285_v36 = vpop.xlane.xlu0 %284 }
 0x333   :  { %408 = vlog2.f32 %v285_v36 }
 0x33d   :  { %v409_v37 = vpop.eup %408 }
 0x33e   :  { %v287_v38 = vmul.f32 0.6931472, %v409_v37 }
 0x340   :  { %v288_v39 = vsub.f32 %v281_v33, %v287_v38 }
 0x342   :  { %289 = vst [vmem:[#allocation8] sm:$0xff] %v288_v39 }
 0x343   :  { %487 = shalt.err (!%p484_p0)
}
 0x344   :  { %s488_s6 = scalar_lea.hbm %s601_s4, 128 }
 0x345   :  { %p489_p1 = scmp.ne.s32.totalorder %s601_s4, %s488_s6  ;;  %p492_p2 = scmp.lt.u32.totalorder %s488_s6, %s601_s4 }
 0x347   :  { %p494_p3 = pnand %p492_p2, %p489_p1 }
 0x349   :  { %497 = shalt.err (!%p494_p3)
}
 0x34a   :  { %299 = dma.vmem_to_hbm [thread:$0]  %s297_s29, 128, %s601_s4, [#allocation4]  }
 0x34b   :  { %502 = dma.done.wait [#allocation4], 128  }
 0x34c   :  { %503 = vsyncadd [#allocation4], 4294967168 }
 0x34d   :  { %303 = vsyncpa [#allocation3], 1 }
 0x34e   :  { %304 = vsyncpa [#allocation6], 1 }
 0x34f   :  { %305 = vsyncpa [#allocation4], 1 }

</bundles_post_ra>
